<compile_context>
chip_gen: v5e
topology: v5e:2x2
jax: 0.10.0
libtpu: 0.0.40
codegen_flags: <defaults>
</compile_context>

<pallas_src>
import jax
import jax.numpy as jnp
from jax.experimental import pallas as pl
from jax.experimental.pallas import tpu as pltpu


# ----------------------------------------------------------------------------
# Kernels
# ----------------------------------------------------------------------------
def _norm_kernel_2d(x_ref, p_ref, o_ref):
    # x_ref/o_ref: (TB, TD) tiles; p_ref: (2, TD) = [scale; bias].
    p = p_ref[...]
    o_ref[...] = x_ref[...] * p[0:1, :] + p[1:2, :]


def _norm_kernel_3d(x_ref, p_ref, o_ref):
    # x_ref/o_ref: (B, TS, 128) tiles; p_ref: (2, TS, 128) = [scale; bias].
    p = p_ref[...]
    o_ref[...] = x_ref[...] * p[0:1] + p[1:2]


# ----------------------------------------------------------------------------
# Generation-aware sizing helpers
# ----------------------------------------------------------------------------
def _vmem_capacity_bytes():
    try:
        info = pltpu.get_tpu_info()
        cap = getattr(info, "vmem_capacity_bytes", None)
        if cap:
            return int(cap)
    except Exception:
        pass
    return 64 << 20  # conservative fallback: v7x per-TensorCore VMEM


def _budgets():
    """Return (block_target_bytes, vmem_limit_bytes) for this TPU generation."""
    cap = _vmem_capacity_bytes()
    if cap >= (96 << 20):        # v5e / v6e: 128 MiB physical VMEM
        return 8 << 20, 64 << 20
    # v7x: 64 MiB per TC -> smaller blocks, keep working set well under cap.
    return 4 << 20, 44 << 20


def _legal_block(t, full, unit):
    """Largest legal block extent: multiple of `unit`, or the full extent."""
    if t >= full or full <= unit:
        return full
    return max(unit, (t // unit) * unit)


def _choose_tiles_2d(B, D, dtype_bytes, block_target, vmem_limit):
    # Lane (last) dim: only tile when 128-divisible; otherwise keep full.
    if D % 128 == 0 and 8 * D * dtype_bytes > block_target:
        td = _legal_block(block_target // (8 * dtype_bytes), D, 128)
    else:
        td = D
    # Sublane dim.
    tb = _legal_block(max(1, block_target // (td * dtype_bytes)), B, 8)

    # v7x: guarantee >=2 parallel tiles when the problem allows it, so both
    # TensorCores get work (harmless on single-TC v5e/v6e).
    if tb == B and td == D:
        if B >= 16:
            tb = _legal_block(B // 2, B, 8)
        elif D % 256 == 0 and D >= 256:
            td = _legal_block(D // 2, D, 128)

    # VMEM guard: x + out double-buffered (4 blocks) + params double-buffered.
    def ws(tb_, td_):
        return (4 * tb_ * td_ + 2 * 2 * td_) * dtype_bytes

    budget = max(vmem_limit - (2 << 20), 1 << 20)
    while tb > 8 and ws(tb, td) > budget:
        tb = _legal_block(tb // 2, B, 8)
    while td > 128 and D % 128 == 0 and ws(tb, td) > budget:
        td = _legal_block(td // 2, D, 128)
    # TODO(synk): very large non-128-divisible D could still exceed the budget
    # here (full-D row forced); vmem_limit is raised to cover it below.
    return tb, td, ws(tb, td)


def _choose_ts_3d(B, chunks, dtype_bytes, block_target, vmem_limit):
    row_bytes = B * 128 * dtype_bytes  # one chunk-row of the x block
    ts = _legal_block(max(1, block_target // row_bytes), chunks, 8)

    # v7x: >=2 parallel tiles when possible.
    if ts == chunks and chunks >= 16:
        ts = _legal_block(chunks // 2, chunks, 8)

    def ws(t):
        return (4 * B * t * 128 + 2 * 2 * t * 128) * dtype_bytes

    budget = max(vmem_limit - (2 << 20), 1 << 20)
    while ts > 8 and ws(ts) > budget:
        ts = _legal_block(ts // 2, chunks, 8)
    return ts, ws(ts)


# ----------------------------------------------------------------------------
# Forward wrapper (equivalent of Preprocessor.forward)
# ----------------------------------------------------------------------------
def preprocessor_forward(x_nchw, mean, std, *, donate_input=False):
    """x_nchw: (B,C,H,W); mean, std: (D,) with D = C*H*W; returns (B,C,H,W)."""
    B, C, H, W = x_nchw.shape
    D = C * H * W
    dtype = x_nchw.dtype
    dtype_bytes = jnp.dtype(dtype).itemsize

    # Precompute once over D elements (outside the kernel):
    #   (x - mean) / std == x * (1/std) + (-mean/std)   (up to ~1 ulp)
    scale = (1.0 / std).astype(dtype)
    bias = (-mean / std).astype(dtype)

    block_target, vmem_limit = _budgets()
    cost = pl.CostEstimate(
        flops=2 * B * D,
        transcendentals=0,
        bytes_accessed=(2 * B * D + 2 * D) * dtype_bytes,
    )
    io_alias = {0: 0} if donate_input else {}

    use_3d = (B < 8) and (D % 128 == 0)

    if use_3d:
        # Sublane packing for tiny batches: put a D-derived axis in the
        # second-to-last position so every (8,128) vreg is fully used.
        chunks = D // 128
        x3 = x_nchw.reshape(B, chunks, 128)
        params = jnp.stack(
            [scale.reshape(chunks, 128), bias.reshape(chunks, 128)], axis=0
        )  # (2, chunks, 128)
        ts, ws = _choose_ts_3d(B, chunks, dtype_bytes, block_target, vmem_limit)
        vmem_limit = min(max(vmem_limit, ws + (4 << 20)), 128 << 20)
        grid = (pl.cdiv(chunks, ts),)

        out3 = pl.pallas_call(
            _norm_kernel_3d,
            out_shape=jax.ShapeDtypeStruct((B, chunks, 128), dtype),
            grid=grid,
            in_specs=[
                pl.BlockSpec((B, ts, 128), lambda s: (0, s, 0)),
                pl.BlockSpec((2, ts, 128), lambda s: (0, s, 0)),
            ],
            out_specs=pl.BlockSpec((B, ts, 128), lambda s: (0, s, 0)),
            compiler_params=pltpu.CompilerParams(
                dimension_semantics=("parallel",),
                vmem_limit_bytes=vmem_limit,
            ),
            cost_estimate=cost,
            input_output_aliases=io_alias,
        )(x3, params)
        return out3.reshape(B, C, H, W)

    # Generic 2-D path.
    x2 = x_nchw.reshape(B, D)
    params = jnp.stack([scale, bias], axis=0)  # (2, D)
    tb, td, ws = _choose_tiles_2d(B, D, dtype_bytes, block_target, vmem_limit)
    vmem_limit = min(max(vmem_limit, ws + (4 << 20)), 128 << 20)

    # Grid: D-tiles OUTER, B-tiles INNER so the params block index (0, j) is
    # constant across the inner loop and its DMA is skipped on revisits.
    grid = (pl.cdiv(D, td), pl.cdiv(B, tb))

    out2 = pl.pallas_call(
        _norm_kernel_2d,
        out_shape=jax.ShapeDtypeStruct((B, D), dtype),
        grid=grid,
        in_specs=[
            pl.BlockSpec((tb, td), lambda j, i: (i, j)),
            pl.BlockSpec((2, td), lambda j, i: (0, j)),
        ],
        out_specs=pl.BlockSpec((tb, td), lambda j, i: (i, j)),
        compiler_params=pltpu.CompilerParams(
            dimension_semantics=("parallel", "parallel"),
            vmem_limit_bytes=vmem_limit,
        ),
        cost_estimate=cost,
        input_output_aliases=io_alias,
    )(x2, params)
    return out2.reshape(B, C, H, W)


def preprocessor_forward_ref(x_nchw, mean, std):
    B, C, H, W = x_nchw.shape
    D = C * H * W
    return ((x_nchw.reshape(B, D) - mean) / std).reshape(B, C, H, W)


if __name__ == "__main__":
    key = jax.random.PRNGKey(0)

    # Case 1: module-consistent small shape (tiny batch -> 3-D packed path).
    B, C, H, W = 2, 4, 16, 16
    D = C * H * W  # 1024
    kx, km, kv, key = jax.random.split(key, 4)
    x = jax.random.normal(kx, (B, C, H, W), dtype=jnp.float32)
    mean = jax.random.normal(km, (D,), dtype=jnp.float32) * 0.1
    var = jax.random.uniform(kv, (D,), dtype=jnp.float32, minval=0.5, maxval=1.5)
    std = jnp.sqrt(var)  # matches Preprocessor.prepare (no epsilon)

    ref = preprocessor_forward_ref(x, mean, std)
    out = jax.block_until_ready(preprocessor_forward(x, mean, std))
    assert out.shape == (B, C, H, W) and out.dtype == jnp.float32
    assert jnp.allclose(out, ref, atol=1e-5, rtol=1e-5)

    # Case 2: batch >= 8 exercises the 2-D tiled path (D-outer/B-inner grid).
    B2, C2, H2, W2 = 8, 4, 8, 8
    D2 = C2 * H2 * W2  # 256
    kx2, km2, kv2, key = jax.random.split(key, 4)
    x2 = jax.random.normal(kx2, (B2, C2, H2, W2), dtype=jnp.float32)
    mean2 = jax.random.normal(km2, (D2,), dtype=jnp.float32) * 0.1
    var2 = jax.random.uniform(kv2, (D2,), dtype=jnp.float32, minval=0.5, maxval=1.5)
    std2 = jnp.sqrt(var2)

    ref2 = preprocessor_forward_ref(x2, mean2, std2)
    out2 = jax.block_until_ready(preprocessor_forward(x2, mean2, std2))
    assert out2.shape == (B2, C2, H2, W2) and out2.dtype == jnp.float32
    assert jnp.allclose(out2, ref2, atol=1e-5, rtol=1e-5)

    print("KERNEL_OK")
</pallas_src>

<mosaic_0001>
module attributes {stable_mosaic.version = 11 : i64} {
  func.func @_norm_kernel_3d(%arg0: i32, %arg1: memref<2x8x128xf32, #tpu.memory_space<vmem>>, %arg2: memref<2x8x128xf32, #tpu.memory_space<vmem>>, %arg3: memref<2x8x128xf32, #tpu.memory_space<vmem>>) attributes {dimension_semantics = [#tpu.dimension_semantics<parallel>], iteration_bounds = array<i64: 1>, scalar_prefetch = 0 : i64, scratch_operands = 0 : i64, tpu.core_type = #tpu.core_type<tc>, window_params = [{transform_indices = @transform_0, window_bounds = array<i64: 2, 8, 128>}, {transform_indices = @transform_1, window_bounds = array<i64: 2, 8, 128>}, {transform_indices = @transform_2, window_bounds = array<i64: 2, 8, 128>}]} {
    %c0 = arith.constant 0 : index
    %c0_0 = arith.constant 0 : index
    %c0_1 = arith.constant 0 : index
    %0 = vector.load %arg2[%c0, %c0_0, %c0_1] : memref<2x8x128xf32, #tpu.memory_space<vmem>>, vector<2x8x128xf32>
    %c0_2 = arith.constant 0 : index
    %c0_3 = arith.constant 0 : index
    %c0_4 = arith.constant 0 : index
    %1 = vector.load %arg1[%c0_2, %c0_3, %c0_4] : memref<2x8x128xf32, #tpu.memory_space<vmem>>, vector<2x8x128xf32>
    %2 = vector.extract_strided_slice %0 {offsets = [0, 0, 0], sizes = [1, 8, 128], strides = [1, 1, 1]} : vector<2x8x128xf32> to vector<1x8x128xf32>
    %3 = vector.broadcast %2 : vector<1x8x128xf32> to vector<2x8x128xf32>
    %4 = arith.mulf %1, %3 : vector<2x8x128xf32>
    %5 = vector.extract_strided_slice %0 {offsets = [1, 0, 0], sizes = [1, 8, 128], strides = [1, 1, 1]} : vector<2x8x128xf32> to vector<1x8x128xf32>
    %6 = vector.broadcast %5 : vector<1x8x128xf32> to vector<2x8x128xf32>
    %7 = arith.addf %4, %6 : vector<2x8x128xf32>
    %c0_5 = arith.constant 0 : index
    %c0_6 = arith.constant 0 : index
    %c0_7 = arith.constant 0 : index
    %8 = vector.load %arg3[%c0_5, %c0_6, %c0_7] : memref<2x8x128xf32, #tpu.memory_space<vmem>>, vector<2x8x128xf32>
    tpu.vector_store %arg3[%c0_5, %c0_6, %c0_7], %7 {strides = array<i32>} : memref<2x8x128xf32, #tpu.memory_space<vmem>>, vector<2x8x128xf32>,
    return
  }
  func.func @transform_0(%arg0: i32) -> (i32, i32, i32) {
    %c0_i32 = arith.constant 0 : i32
    %c0_i32_0 = arith.constant 0 : i32
    %c0_i32_1 = arith.constant 0 : i32
    return %c0_i32, %arg0, %c0_i32_0 : i32, i32, i32
  }
  func.func @transform_1(%arg0: i32) -> (i32, i32, i32) {
    %c0_i32 = arith.constant 0 : i32
    %c0_i32_0 = arith.constant 0 : i32
    %c0_i32_1 = arith.constant 0 : i32
    return %c0_i32, %arg0, %c0_i32_0 : i32, i32, i32
  }
  func.func @transform_2(%arg0: i32) -> (i32, i32, i32) {
    %c0_i32 = arith.constant 0 : i32
    %c0_i32_0 = arith.constant 0 : i32
    %c0_i32_1 = arith.constant 0 : i32
    return %c0_i32, %arg0, %c0_i32_0 : i32, i32, i32
  }
}

</mosaic_0001>

<bundles_post_ra>
// kernel: tpu_custom_call.1
= control target key start
LH: loop header
LB: loop body
LE: loop exit
PB: predicated region body
PF: predicated region fallthrough
CT: control target
= control target key end

     0   :  { %7 = vsyncpa [#allocation3], 0  ;;  %s195_s0 = inlined_call_operand.hbm [shape: f32[2,8,128], index: 0, kind: input, shape index: {}]   ;;  %s196_s1 = inlined_call_operand.hbm [shape: f32[2,8,128], index: 1, kind: input, shape index: {}]   ;;  %s197_s2 = inlined_call_operand.hbm [shape: f32[2,8,128], index: 2, kind: output, shape index: {}]  }
   0x1   :  { %8 = vsyncpa [#allocation6], 0 }
   0x2   :  { %9 = vsyncpa [#allocation4], 0  ;;  %s14_s11 = sshll.u32 %s195_s0, 4  ;;  %s157_s12 = smov [#allocation2]   ;;  %s15_s11 = int_to_ptr.hbm [resolvable:$true] %s14_s11 }
   0x3   :  { %s16_s13 = sshll.u32 %s157_s12, 4  ;;  %s27_s16 = sshll.u32 %s196_s1, 4  ;;  %s17_s13 = int_to_ptr.vmem [resolvable:$true] %s16_s13  ;;  %s28_s16 = int_to_ptr.hbm [resolvable:$true] %s27_s16 }
   0x4   :  { %s158_s17 = smov 128   ;;  %s159_s18 = smov 8  }
   0x5   :  { %22 = dma.hbm_to_vmem [thread:$0]  %s15_s11, 256, %s17_s13, [#allocation3], %s158_s17, %s158_s17, %s159_s18  }
   0x6   :  { %s160_s19 = smov [#allocation5]  }
   0x7   :  { %s29_s20 = sshll.u32 %s160_s19, 4  ;;  %s30_s20 = int_to_ptr.vmem [resolvable:$true] %s29_s20 }
   0x8   :  { %35 = dma.hbm_to_vmem [thread:$0]  %s28_s16, 256, %s30_s20, [#allocation6], %s158_s17, %s158_s17, %s159_s18  }
   0x9   :  { %151 = dma.done.wait [#allocation3], 256  }
   0xa   :  { %152 = vsyncadd [#allocation3], 4294967040 }
   0xb   :  { %153 = dma.done.wait [#allocation6], 256  }
   0xc   :  { %154 = vsyncadd [#allocation6], 4294967040  ;;  %v44_v0 = vld [vmem:[#allocation5] sm:$0xff]  ;;  %v45_v1 = vld [vmem:[#allocation5 + $0x8] sm:$0xff]  ;;  %s161_s0 = smov [#allocation7]   ;;  %s60_s23 = sshll.u32 %s197_s2, 4  ;;  %s61_s23 = int_to_ptr.hbm [resolvable:$true] %s60_s23 }
   0xd   :  { %v46_v2 = vld [vmem:[#allocation2] sm:$0xff]  ;;  %v47_v4 = vld [vmem:[#allocation2 + $0x8] sm:$0xff]  ;;  %s58_s1 = sshll.u32 %s161_s0, 4  ;;  %s59_s1 = int_to_ptr.vmem [resolvable:$true] %s58_s1 }
   0xe   :  { %v48_v3 = vmul.f32 %v46_v2, %v44_v0  ;;  %v49_v5 = vmul.f32 %v47_v4, %v44_v0 }
  0x10   :  { %v50_v6 = vadd.f32 %v48_v3, %v45_v1  ;;  %v51_v7 = vadd.f32 %v49_v5, %v45_v1 }
  0x12   :  { %52 = vst [vmem:[#allocation7] sm:$0xff] %v50_v6 }
  0x13   :  { %53 = vst [vmem:[#allocation7 + $0x8] sm:$0xff] %v51_v7 }
  0x14   :  { %66 = dma.vmem_to_hbm [thread:$0]  %s59_s1, 256, %s61_s23, [#allocation4], %s158_s17, %s158_s17, %s159_s18  }
  0x15   :  { %155 = dma.done.wait [#allocation4], 256  }
  0x16   :  { %156 = vsyncadd [#allocation4], 4294967040 }
  0x17   :  { %71 = vsyncpa [#allocation3], 1 }
  0x18   :  { %72 = vsyncpa [#allocation6], 1 }
  0x19   :  { %73 = vsyncpa [#allocation4], 1 }

</bundles_post_ra>
